<compile_context>
chip_gen: v7x
topology: tpu7x:2x2x1
jax: 0.10.0
libtpu: 0.0.40
codegen_flags: <defaults>
</compile_context>

<pallas_src>
import jax
import jax.numpy as jnp
from jax import lax
from jax.experimental import pallas as pl
from jax.experimental.pallas import tpu as pltpu


def _mech_kernel(xu_ref, w1_ref, w2_ref, b2_ref, o_ref):
    # xu_ref : (4, BM)  rows = [x0, x1, u, 1]           (lane-dense batch)
    # w1_ref : (H, 4)   first layer, transposed, bias folded as last column
    # w2_ref : (1, H)   second layer, pre-scaled by 1/dt
    # b2_ref : (1, 1)   second-layer bias, pre-scaled by 1/dt
    xu = xu_ref[...]

    # First layer + bias on the MXU (K=4 is padded; MXU is otherwise idle).
    h = jnp.dot(w1_ref[...], xu,
                preferred_element_type=jnp.float32,
                precision=lax.Precision.HIGHEST)          # (H, BM)
    h = jnp.maximum(h, 0.0)                               # ReLU on the VPU

    # Second layer (K=64 reduction) on the MXU.
    dv = jnp.dot(w2_ref[...], h,
                 preferred_element_type=jnp.float32,
                 precision=lax.Precision.HIGHEST)         # (1, BM)
    o_ref[...] = dv + b2_ref[...]


def _round_up(n, m):
    return (n + m - 1) // m * m


def mechanical_system_forward(x1, u1, params, dt, block_m=8192):
    """x1: (..., 2), u1: (..., 1) -> dx: (..., 2) float32."""
    w1, b1, w2, b2 = params                 # (3, H), (H,), (H, 1), (1,)
    lead = x1.shape[:-1]
    M = 1
    for d in lead:
        M *= d

    n_x = x1.shape[-1]
    hidden = w1.shape[1]
    kin = n_x + 2                           # [x0, x1, u, ones] = 4 input rows

    # Single lane-dense input buffer: flattened batch on the lane axis,
    # features (plus a ones row for the folded bias) on sublanes.
    x_t = jnp.transpose(x1.reshape(M, n_x).astype(jnp.float32))     # (2, M)
    u_t = jnp.transpose(u1.reshape(M, 1).astype(jnp.float32))       # (1, M)
    ones = jnp.ones((1, M), jnp.float32)
    xu = jnp.concatenate([x_t, u_t, ones], axis=0)                  # (4, M)

    # Block size: multiple of 128 (BlockSpec rule), capped, and kept small
    # enough that the grid has >=2 steps when possible (v7x megacore).
    bm = _round_up(max(int(block_m), 128), 128)
    bm = min(bm, 32768)
    bm = min(bm, max(128, _round_up(pl.cdiv(M, 2), 128)))
    m_pad = _round_up(M, bm)
    pad = m_pad - M
    if pad:
        # Padded columns are all-zero -> compute relu(0)*w2 + b2 garbage that
        # is sliced off below.
        xu = jnp.pad(xu, ((0, 0), (0, pad)))

    inv_dt = jnp.float32(1.0 / float(dt))
    w1_aug = jnp.concatenate(
        [jnp.transpose(jnp.asarray(w1, jnp.float32)),                 # (H, 3)
         jnp.asarray(b1, jnp.float32).reshape(hidden, 1)], axis=1)    # (H, 4)
    w2_row = jnp.asarray(w2, jnp.float32).reshape(1, hidden) * inv_dt  # (1, H)
    b2_c = jnp.asarray(b2, jnp.float32).reshape(1, 1) * inv_dt         # (1, 1)

    grid = (m_pad // bm,)
    cost = pl.CostEstimate(
        flops=int(m_pad) * (2 * hidden * kin + hidden + 2 * hidden),
        transcendentals=0,
        bytes_accessed=int(m_pad) * (kin + 1) * 4
        + (hidden * kin + hidden + 1) * 4,
    )

    dv_t = pl.pallas_call(
        _mech_kernel,
        out_shape=jax.ShapeDtypeStruct((1, m_pad), jnp.float32),
        grid=grid,
        in_specs=[
            pl.BlockSpec((kin, bm), lambda i: (0, i)),           # xu  : row blocks
            pl.BlockSpec((hidden, kin), lambda i: (0, 0)),       # w1^T|b1 : resident
            pl.BlockSpec((1, hidden), lambda i: (0, 0)),         # w2/dt   : resident
            pl.BlockSpec((1, 1), lambda i: (0, 0)),              # b2/dt   : resident
        ],
        out_specs=pl.BlockSpec((1, bm), lambda i: (0, i)),
        compiler_params=pltpu.CompilerParams(
            dimension_semantics=("parallel",),
            # Headroom for block sweeps; stays under v7x's 64 MiB physical VMEM.
            vmem_limit_bytes=48 * 1024 * 1024,
        ),
        cost_estimate=cost,
    )(xu, w1_aug, w2_row, b2_c)

    dv = jnp.transpose(dv_t[:, :M]).reshape(*lead, 1)
    # dx = cat([x1[..., [1]], dv], -1) — pass-through channel stays in XLA.
    return jnp.concatenate([x1[..., 1:2].astype(jnp.float32), dv], axis=-1)


def init_params(key, n_x=2, hidden=64, init_small=True):
    """Matches nn.Linear shapes; init_small -> N(0, 0.001) weights, zero bias."""
    k1, k2 = jax.random.split(key)
    std = 0.001 if init_small else 0.1
    # Stored as (in_features, out_features); kernel consumes the transpose.
    w1 = std * jax.random.normal(k1, (n_x + 1, hidden), dtype=jnp.float32)
    b1 = jnp.zeros((hidden,), dtype=jnp.float32)
    w2 = std * jax.random.normal(k2, (hidden, 1), dtype=jnp.float32)
    b2 = jnp.zeros((1,), dtype=jnp.float32)
    return w1, b1, w2, b2


def reference_forward(x1, u1, params, dt):
    w1, b1, w2, b2 = params
    xu = jnp.concatenate([x1, u1], axis=-1)
    h = jnp.maximum(xu @ w1 + b1, 0.0)
    dv = (h @ w2 + b2) / dt
    return jnp.concatenate([x1[..., 1:2], dv], axis=-1)


if __name__ == "__main__":
    key = jax.random.PRNGKey(0)
    kx, ku, kp = jax.random.split(key, 3)

    batch, seq, n_x = 2, 8, 2
    dt = 0.01

    x1 = jax.random.normal(kx, (batch, seq, n_x), dtype=jnp.float32)
    u1 = jax.random.normal(ku, (batch, seq, 1), dtype=jnp.float32)
    params = init_params(kp, n_x=n_x, hidden=64, init_small=True)

    dx = mechanical_system_forward(x1, u1, params, dt)
    dx = jax.block_until_ready(dx)

    ref = reference_forward(x1, u1, params, dt)
    assert dx.shape == (batch, seq, 2)
    assert jnp.allclose(dx, ref, atol=1e-4, rtol=1e-4)

    print("KERNEL_OK")
</pallas_src>

<mosaic_0001>
module attributes {stable_mosaic.version = 11 : i64} {
  func.func @_mech_kernel(%arg0: i32, %arg1: memref<4x128xf32, #tpu.memory_space<vmem>>, %arg2: memref<64x4xf32, #tpu.memory_space<vmem>>, %arg3: memref<1x64xf32, #tpu.memory_space<vmem>>, %arg4: memref<1x1xf32, #tpu.memory_space<vmem>>, %arg5: memref<1x128xf32, #tpu.memory_space<vmem>>) attributes {dimension_semantics = [#tpu.dimension_semantics<parallel>], iteration_bounds = array<i64: 1>, scalar_prefetch = 0 : i64, scratch_operands = 0 : i64, tpu.core_type = #tpu.core_type<tc>, window_params = [{transform_indices = @transform_0, window_bounds = array<i64: 4, 128>}, {pipeline_mode = #tpu.pipeline_mode<synchronous>, transform_indices = @transform_1, window_bounds = array<i64: 64, 4>}, {pipeline_mode = #tpu.pipeline_mode<synchronous>, transform_indices = @transform_2, window_bounds = array<i64: 1, 64>}, {pipeline_mode = #tpu.pipeline_mode<synchronous>, transform_indices = @transform_3, window_bounds = array<i64: 1, 1>}, {transform_indices = @transform_4, window_bounds = array<i64: 1, 128>}]} {
    %c0 = arith.constant 0 : index
    %c0_0 = arith.constant 0 : index
    %0 = vector.load %arg1[%c0, %c0_0] : memref<4x128xf32, #tpu.memory_space<vmem>>, vector<4x128xf32>
    %c0_1 = arith.constant 0 : index
    %c0_2 = arith.constant 0 : index
    %1 = vector.load %arg2[%c0_1, %c0_2] : memref<64x4xf32, #tpu.memory_space<vmem>>, vector<64x4xf32>
    %cst = arith.constant dense<0.000000e+00> : vector<64x128xf32>
    %2 = tpu.matmul %1, %0, %cst {dimension_numbers = #tpu.dot_dimension_numbers<[1], [0], [0], [1], [0, 0, 1, 1], [], []>, precision = #tpu.contract_precision<fp32>} : vector<64x4xf32>, vector<4x128xf32>, vector<64x128xf32> -> vector<64x128xf32>
    %cst_3 = arith.constant 0.000000e+00 : f32
    %3 = vector.broadcast %cst_3 : f32 to vector<64x128xf32>
    %4 = arith.maximumf %2, %3 : vector<64x128xf32>
    %c0_4 = arith.constant 0 : index
    %c0_5 = arith.constant 0 : index
    %5 = vector.load %arg3[%c0_4, %c0_5] : memref<1x64xf32, #tpu.memory_space<vmem>>, vector<1x64xf32>
    %cst_6 = arith.constant dense<0.000000e+00> : vector<1x128xf32>
    %6 = tpu.matmul %5, %4, %cst_6 {dimension_numbers = #tpu.dot_dimension_numbers<[1], [0], [0], [1], [0, 0, 1, 1], [], []>, precision = #tpu.contract_precision<fp32>} : vector<1x64xf32>, vector<64x128xf32>, vector<1x128xf32> -> vector<1x128xf32>
    %c0_7 = arith.constant 0 : index
    %c0_8 = arith.constant 0 : index
    %7 = vector.load %arg4[%c0_7, %c0_8] : memref<1x1xf32, #tpu.memory_space<vmem>>, vector<1x1xf32>
    %8 = vector.broadcast %7 : vector<1x1xf32> to vector<1x128xf32>
    %9 = arith.addf %6, %8 : vector<1x128xf32>
    %c0_9 = arith.constant 0 : index
    %c0_10 = arith.constant 0 : index
    %10 = vector.load %arg5[%c0_9, %c0_10] : memref<1x128xf32, #tpu.memory_space<vmem>>, vector<1x128xf32>
    tpu.vector_store %arg5[%c0_9, %c0_10], %9 {strides = array<i32>} : memref<1x128xf32, #tpu.memory_space<vmem>>, vector<1x128xf32>,
    return
  }
  func.func @transform_0(%arg0: i32) -> (i32, i32) {
    %c0_i32 = arith.constant 0 : i32
    %c0_i32_0 = arith.constant 0 : i32
    return %c0_i32, %arg0 : i32, i32
  }
  func.func @transform_1(%arg0: i32) -> (i32, i32) {
    %c0_i32 = arith.constant 0 : i32
    %c0_i32_0 = arith.constant 0 : i32
    %c0_i32_1 = arith.constant 0 : i32
    return %c0_i32, %c0_i32_0 : i32, i32
  }
  func.func @transform_2(%arg0: i32) -> (i32, i32) {
    %c0_i32 = arith.constant 0 : i32
    %c0_i32_0 = arith.constant 0 : i32
    %c0_i32_1 = arith.constant 0 : i32
    return %c0_i32, %c0_i32_0 : i32, i32
  }
  func.func @transform_3(%arg0: i32) -> (i32, i32) {
    %c0_i32 = arith.constant 0 : i32
    %c0_i32_0 = arith.constant 0 : i32
    %c0_i32_1 = arith.constant 0 : i32
    return %c0_i32, %c0_i32_0 : i32, i32
  }
  func.func @transform_4(%arg0: i32) -> (i32, i32) {
    %c0_i32 = arith.constant 0 : i32
    %c0_i32_0 = arith.constant 0 : i32
    return %c0_i32, %arg0 : i32, i32
  }
}

</mosaic_0001>

<bundles_post_ra>
// kernel: tpu_custom_call.1
= control target key start
LH: loop header
LB: loop body
LE: loop exit
PB: predicated region body
PF: predicated region fallthrough
CT: control target
= control target key end

     0   :  { %s2117_s0 = inlined_call_operand.vmem [shape: f32[4,128], index: 0, kind: input, shape index: {}]   ;;  %s2118_s1 = inlined_call_operand.vmem [shape: f32[64,4], index: 1, kind: input, shape index: {}]   ;;  %s2119_s2 = inlined_call_operand.vmem [shape: f32[1,64], index: 2, kind: input, shape index: {}]   ;;  %s2120_s3 = inlined_call_operand.<no memory space> [shape: f32[1,1], index: 3, kind: input, shape index: {}]   ;;  %s2121_s4 = inlined_call_operand.hbm [shape: f32[1,128], index: 4, kind: output, shape index: {}]  }
   0x1   :  { %v9_v0 = vstv %s2120_s3 }
   0x2   :  { %10 = vst [vmem:[#allocation2] sm:$0x1] %v9_v0 }
   0x3   :  { %v20_v1 = vld [vmem:[%s2117_s0] sm:$0xf]  ;;  %vm54_vm0 = vcmask 1043456   ;;  %vm29_vm1 = vcmask 31744   ;;  %v22_v3 = vld [vmem:[%s2118_s1 + $0x8] sm:$0xff]  ;;  %v23_v7 = vld [vmem:[%s2118_s1 + $0x10] sm:$0xff] }
   0x4   :  { %v21_v2 = vld [vmem:[%s2118_s1] sm:$0xff]  ;;  %v56_v4 = vsel %vm54_vm0, %v20_v1, 0  ;;  %v34_v6 = vsel %vm29_vm1, %v22_v3, 0  ;;  %v24_v8 = vld [vmem:[%s2118_s1 + $0x18] sm:$0xff]  ;;  %v37_v13 = vsel %vm29_vm1, %v23_v7, 0  ;;  %v26_v14 = vld [vmem:[%s2118_s1 + $0x28] sm:$0xff] }
   0x5   :  { %v31_v5 = vsel %vm29_vm1, %v21_v2, 0  ;;  %v25_v9 = vld [vmem:[%s2118_s1 + $0x20] sm:$0xff]  ;;  %v1892_v10 = vand.u32 4294901760, %v56_v4  ;;  %v1896_v12 = vand.u32 4294901760, %v34_v6  ;;  %v27_v15 = vld [vmem:[%s2118_s1 + $0x30] sm:$0xff]  ;;  %v1905_v16 = vand.u32 4294901760, %v37_v13 }
   0x6   :  { %v1894_v11 = vand.u32 4294901760, %v31_v5  ;;  %v40_v17 = vsel %vm29_vm1, %v24_v8, 0  ;;  %v43_v18 = vsel %vm29_vm1, %v25_v9, 0  ;;  %v46_v19 = vsel %vm29_vm1, %v26_v14, 0 }
   0x7   :  { %1488 = vmatprep.subr.mxu0 %v1892_v10  ;;  %v206_v21 = vsub.f32 %v56_v4, %v1892_v10  ;;  %v1916_v22 = vsub.f32 %v34_v6, %v1896_v12  ;;  %v1918_v23 = vand.u32 4294901760, %v40_v17 }
   0x8   :  { %v1912_v20 = vsub.f32 %v31_v5, %v1894_v11 }
   0x9   :  { %11 = vsyncpa [#allocation4], 0  ;;  %1489 = vmatpush3.msra.mxu0 %v1892_v10  ;;  %v1922_v24 = vsub.f32 %v37_v13, %v1905_v16  ;;  %v1924_v25 = vand.u32 4294901760, %v43_v18  ;;  %v1926_v26 = vand.u32 4294901760, %v46_v19  ;;  %v49_v27 = vsel %vm29_vm1, %v27_v15, 0  ;;  %v28_v44 = vld [vmem:[%s2118_s1 + $0x38] sm:$0xff] }
   0xa   :  { %v126_v28 = vand.u32 4294901760, %v1912_v20  ;;  %v1930_v29 = vand.u32 4294901760, %v206_v21  ;;  %v136_v30 = vand.u32 4294901760, %v1916_v22  ;;  %v1934_v31 = vsub.f32 %v40_v17, %v1918_v23  ;;  %v814_v2 = vld [vmem:[#allocation2] sm:$0x1] }
   0xb   :  { %v146_v32 = vand.u32 4294901760, %v1922_v24  ;;  %v1938_v33 = vsub.f32 %v43_v18, %v1924_v25  ;;  %v1941_v34 = vsub.f32 %v46_v19, %v1926_v26  ;;  %v1943_v35 = vand.u32 4294901760, %v49_v27  ;;  %v813_v4 = vld [vmem:[%s2119_s2] sm:$0x1]  ;;  %s1843_s2 = smov [#allocation3]  }
   0xc   :  { %v127_v36 = vsub.f32 %v1912_v20, %v126_v28  ;;  %v208_v37 = vsub.f32 %v206_v21, %v1930_v29  ;;  %v137_v38 = vsub.f32 %v1916_v22, %v136_v30  ;;  %v156_v39 = vand.u32 4294901760, %v1934_v31  ;;  %s1372_s8 = sshll.u32 %s1843_s2, 4  ;;  %s1373_s8 = int_to_ptr.vmem [resolvable:$true] %s1372_s8 }
   0xd   :  { %v147_v40 = vsub.f32 %v1922_v24, %v146_v32  ;;  %v166_v41 = vand.u32 4294901760, %v1938_v33  ;;  %v176_v42 = vand.u32 4294901760, %v1941_v34  ;;  %v185_v43 = vsub.f32 %v49_v27, %v1943_v35  ;;  %s1815_s9 = scalar_lea.vmem %s1373_s8, 16  ;;  %s1819_s10 = scalar_lea.vmem %s1373_s8, 32 }
   0xe   :  { %v128_v45 = vand.u32 4294901760, %v127_v36  ;;  %v209_v46 = vand.u32 4294901760, %v208_v37  ;;  %v138_v47 = vand.u32 4294901760, %v137_v38  ;;  %v157_v48 = vsub.f32 %v1934_v31, %v156_v39  ;;  %p1816_p0 = scmp.ne.s32.totalorder %s1373_s8, %s1815_s9  ;;  %p1820_p1 = scmp.lt.s32.totalorder %s1373_s8, %s1373_s8 }
   0xf   :  { %v148_v49 = vand.u32 4294901760, %v147_v40  ;;  %v167_v50 = vsub.f32 %v1938_v33, %v166_v41  ;;  %v186_v51 = vand.u32 4294901760, %v185_v43  ;;  %v52_v52 = vsel %vm29_vm1, %v28_v44, 0  ;;  %p1821_p2 = scmp.lt.s32.totalorder %s1819_s10, %s1815_s9 }
  0x10   :  { %1490 = vmatprep.mubr.f32.mxu0 %v128_v45  ;;  %1502 = vmatprep.subr.mxu0 %v209_v46  ;;  %v158_v53 = vand.u32 4294901760, %v157_v48  ;;  %v177_v54 = vsub.f32 %v1941_v34, %v176_v42  ;;  %v194_v55 = vand.u32 4294901760, %v52_v52  ;;  %v1839_v0 = vmov 0.0|0.0  }
  0x11   :  { %1491 = vmatmul.mubr.f32.vlgmr.msra.gmra.mrb[0].mxu0 %v138_v47  ;;  %v168_v56 = vand.u32 4294901760, %v167_v50  ;;  %v187_v57 = vsub.f32 %v185_v43, %v186_v51  ;;  %1686 = vmatprep.subr.bf16.mxu1 %v1839_v0  ;;  %vm1840_vm2 = vmmov 0   ;;  %v1841_v1 = vmov 0.0   ;;  %p1822_p3 = por %p1821_p2, %p1820_p1 }
  0x12   :  { %1503 = vmatpush3.msra.mxu0 %v209_v46  ;;  %1493 = vmatprep.mubr.f32.mxu0 %v148_v49  ;;  %v195_v58 = vsub.f32 %v52_v52, %v194_v55  ;;  %v178_v59 = vand.u32 4294901760, %v177_v54  ;;  %v1842_v3 = vmov 0   ;;  %vm824_vm3 = vcmask 523264  }
  0x13   :  { %1516 = vmatprep.subr.mxu0 %v206_v21  ;;  %v188_v61 = vand.u32 4294901760, %v187_v57  ;;  %1588 = vmatprep.mubr.msk.f32.mxu1 %vm1840_vm2, %v1841_v1  ;;  %v826_v5 = vsel %vm824_vm3, %v813_v4, 0  ;;  %p1823_p4 = pnand %p1822_p3, %p1816_p0 }
  0x14   :  { %v196_v60 = vand.u32 4294901760, %v195_v58  ;;  %1814 = vset.pattern.permute.xlu0 %v1842_v3  ;;  %v2011_v9 = vand.u32 4294901760, %v826_v5 }
  0x15   :  { %1494 = vmatmul.mubr.f32.gmra.mrb[2].mxu0 %v158_v53  ;;  %817 = vperm.xlu0 %1814, %v814_v2  }
  0x16   :  { %1496 = vmatprep.mubr.f32.mxu0 %v168_v56  ;;  %v197_v62 = vsub.f32 %v195_v58, %v196_v60  ;;  %v2016_v17 = vsub.f32 %v826_v5, %v2011_v9 }
  0x18   :  { %v198_v63 = vand.u32 4294901760, %v197_v62 }
  0x19   :  { %1497 = vmatmul.mubr.f32.gmra.mrb[4].mxu0 %v178_v59 }
  0x1a   :  { %1499 = vmatprep.mubr.f32.mxu0 %v188_v61 }
  0x1d   :  { %1500 = vmatmul.mubr.f32.gmra.mrb[6].mxu0 %v198_v63 }
  0x1e   :  { %1504 = vmatprep.mubr.f32.mxu0 %v1894_v11 }
  0x21   :  { %1505 = vmatmul.mubr.f32.vlgmr.msra.gmra.mrb[0].mxu0 %v1896_v12 }
  0x22   :  { %1517 = vmatpush3.msra.mxu0 %v206_v21  ;;  %1507 = vmatprep.mubr.f32.mxu0 %v1905_v16 }
  0x23   :  { %1530 = vmatprep.subr.mxu0 %v1892_v10 }
  0x25   :  { %1508 = vmatmul.mubr.f32.gmra.mrb[2].mxu0 %v1918_v23 }
  0x26   :  { %1510 = vmatprep.mubr.f32.mxu0 %v1924_v25 }
  0x29   :  { %1511 = vmatmul.mubr.f32.gmra.mrb[4].mxu0 %v1926_v26 }
  0x2a   :  { %1513 = vmatprep.mubr.f32.mxu0 %v1943_v35 }
  0x2d   :  { %1514 = vmatmul.mubr.f32.gmra.mrb[6].mxu0 %v194_v55 }
  0x2e   :  { %1518 = vmatprep.mubr.f32.mxu0 %v1912_v20 }
  0x31   :  { %1519 = vmatmul.mubr.f32.vlgmr.msra.gmra.mrb[0].mxu0 %v1916_v22 }
  0x32   :  { %1531 = vmatpush3.msra.mxu0 %v1892_v10  ;;  %1521 = vmatprep.mubr.f32.mxu0 %v1922_v24 }
  0x33   :  { %1544 = vmatprep.subr.mxu0 %v1930_v29 }
  0x35   :  { %1522 = vmatmul.mubr.f32.gmra.mrb[2].mxu0 %v1934_v31  ;;  %v903_v31 = vand.u32 4294901760, %v2016_v17 }
  0x36   :  { %1524 = vmatprep.mubr.f32.mxu0 %v1938_v33 }
  0x37   :  { %v904_v49 = vsub.f32 %v2016_v17, %v903_v31 }
  0x39   :  { %1525 = vmatmul.mubr.f32.gmra.mrb[4].mxu0 %v1941_v34 }
  0x3a   :  { %1527 = vmatprep.mubr.f32.mxu0 %v185_v43 }
  0x3d   :  { %1528 = vmatmul.mubr.f32.gmra.mrb[6].mxu0 %v195_v58 }
  0x3e   :  { %1532 = vmatprep.mubr.f32.mxu0 %v126_v28 }
  0x41   :  { %1533 = vmatmul.mubr.f32.vlgmr.msra.gmra.mrb[0].mxu0 %v136_v30 }
  0x42   :  { %1545 = vmatpush3.msra.mxu0 %v1930_v29  ;;  %1535 = vmatprep.mubr.f32.mxu0 %v146_v32 }
  0x43   :  { %1558 = vmatprep.subr.mxu0 %v1892_v10 }
  0x45   :  { %1536 = vmatmul.mubr.f32.gmra.mrb[2].mxu0 %v156_v39 }
  0x46   :  { %1538 = vmatprep.mubr.f32.mxu0 %v166_v41 }
  0x49   :  { %1539 = vmatmul.mubr.f32.gmra.mrb[4].mxu0 %v176_v42 }
  0x4a   :  { %1541 = vmatprep.mubr.f32.mxu0 %v186_v51 }
  0x4d   :  { %1542 = vmatmul.mubr.f32.gmra.mrb[6].mxu0 %v196_v60 }
  0x4e   :  { %1546 = vmatprep.mubr.f32.mxu0 %v1894_v11 }
  0x51   :  { %1547 = vmatmul.mubr.f32.vlgmr.msra.gmra.mrb[0].mxu0 %v1896_v12 }
  0x52   :  { %1559 = vmatpush3.msra.mxu0 %v1892_v10  ;;  %1549 = vmatprep.mubr.f32.mxu0 %v1905_v16 }
  0x55   :  { %1550 = vmatmul.mubr.f32.gmra.mrb[2].mxu0 %v1918_v23 }
  0x56   :  { %1552 = vmatprep.mubr.f32.mxu0 %v1924_v25 }
  0x59   :  { %1553 = vmatmul.mubr.f32.gmra.mrb[4].mxu0 %v1926_v26 }
  0x5a   :  { %1555 = vmatprep.mubr.f32.mxu0 %v1943_v35 }
  0x5d   :  { %1556 = vmatmul.mubr.f32.gmra.mrb[6].mxu0 %v194_v55 }
  0x5e   :  { %1560 = vmatprep.mubr.f32.mxu0 %v1894_v11 }
  0x61   :  { %1561 = vmatmul.mubr.f32.vlgmr.msra.gmra.mrb[0].mxu0 %v1896_v12 }
  0x62   :  { %1563 = vmatprep.mubr.f32.mxu0 %v1905_v16 }
  0x65   :  { %1564 = vmatmul.mubr.f32.gmra.mrb[2].mxu0 %v1918_v23 }
  0x66   :  { %1566 = vmatprep.mubr.f32.mxu0 %v1924_v25 }
  0x69   :  { %1567 = vmatmul.mubr.f32.gmra.mrb[4].mxu0 %v1926_v26 }
  0x6a   :  { %1569 = vmatprep.mubr.f32.mxu0 %v1943_v35 }
  0x6d   :  { %1570 = vmatmul.mubr.f32.gmra.mrb[6].mxu0 %v194_v55 }
 0x134   :  { %v1562_v6 = vpop.f32.mrb[0].mxu0 }
 0x135   :  { %v806_v7 = vmax.f32 %v1562_v6, 0.0  ;;  %v759_v8 = vpop.f32.mrb[1].mxu0 }
 0x136   :  { %v805_v10 = vmax.f32 %v759_v8, 0.0 }
 0x137   :  { %v832_v11 = vand.u32 4294901760, %v806_v7 }
 0x138   :  { %v829_v12 = vand.u32 4294901760, %v805_v10  ;;  %v1565_v13 = vpop.f32.mrb[2].mxu0 }
 0x139   :  { %v2013_v14 = vsub.f32 %v806_v7, %v832_v11  ;;  %v808_v15 = vmax.f32 %v1565_v13, 0.0  ;;  %v771_v16 = vpop.f32.mrb[3].mxu0 }
 0x13a   :  { %v2018_v18 = vsub.f32 %v805_v10, %v829_v12  ;;  %v807_v19 = vmax.f32 %v771_v16, 0.0  ;;  %v2020_v20 = vpack.c.bf16 %v832_v11, %v829_v12  ;;  %v905_v10 = vand.u32 4294901760, %v904_v49 }
 0x13b   :  { %v921_v21 = vand.u32 4294901760, %v2013_v14  ;;  %v838_v22 = vand.u32 4294901760, %v808_v15 }
 0x13c   :  { %v914_v23 = vand.u32 4294901760, %v2018_v18  ;;  %v1711_v24 = vpack.c.bf16 %v2013_v14, %v2018_v18  ;;  %v835_v25 = vand.u32 4294901760, %v807_v19  ;;  %v1568_v26 = vpop.f32.mrb[4].mxu0  ;;  %1688 = vmatpush3.bf16.msra.mxu1 %v2020_v20 }
 0x13d   :  { %v922_v27 = vsub.f32 %v2013_v14, %v921_v21  ;;  %v2028_v28 = vsub.f32 %v808_v15, %v838_v22  ;;  %v810_v29 = vmax.f32 %v1568_v26, 0.0  ;;  %v783_v30 = vpop.f32.mrb[5].mxu0  ;;  %1689 = vmatprep.subr.bf16.mxu1 %v1839_v0  ;;  %v820_v14 = vlaneseq }
 0x13e   :  { %v915_v32 = vsub.f32 %v2018_v18, %v914_v23  ;;  %v2033_v33 = vsub.f32 %v807_v19, %v835_v25  ;;  %v809_v34 = vmax.f32 %v783_v30, 0.0  ;;  %v2035_v35 = vpack.c.bf16 %v838_v22, %v835_v25 }
 0x13f   :  { %v923_v36 = vand.u32 4294901760, %v922_v27  ;;  %v935_v37 = vand.u32 4294901760, %v2028_v28  ;;  %v844_v38 = vand.u32 4294901760, %v810_v29  ;;  %v2038_v39 = vpack.c.bf16 %v921_v21, %v914_v23 }
 0x140   :  { %v916_v40 = vand.u32 4294901760, %v915_v32  ;;  %v928_v41 = vand.u32 4294901760, %v2033_v33  ;;  %v1714_v42 = vpack.c.bf16 %v2028_v28, %v2033_v33  ;;  %v841_v43 = vand.u32 4294901760, %v809_v34  ;;  %v1571_v44 = vpop.f32.mrb[6].mxu0  ;;  %1691 = vmatpush3.bf16.msra.mxu1 %v2035_v35 }
 0x141   :  { %v936_v45 = vsub.f32 %v2028_v28, %v935_v37  ;;  %v948_v46 = vsub.f32 %v810_v29, %v844_v38  ;;  %v812_v47 = vmax.f32 %v1571_v44, 0.0  ;;  %v795_v48 = vpop.f32.mrb[7].mxu0  ;;  %1692 = vmatprep.subr.bf16.mxu1 %v1839_v0 }
 0x142   :  { %v929_v50 = vsub.f32 %v2033_v33, %v928_v41  ;;  %v941_v51 = vsub.f32 %v809_v34, %v841_v43  ;;  %v811_v52 = vmax.f32 %v795_v48, 0.0  ;;  %v2050_v53 = vpack.c.bf16 %v844_v38, %v841_v43 }
 0x143   :  { %v937_v54 = vand.u32 4294901760, %v936_v45  ;;  %v949_v55 = vand.u32 4294901760, %v948_v46  ;;  %v850_v56 = vand.u32 4294901760, %v812_v47  ;;  %v1699_v57 = vpack.c.bf16 %v923_v36, %v916_v40 }
 0x144   :  { %v930_v58 = vand.u32 4294901760, %v929_v50  ;;  %v942_v59 = vand.u32 4294901760, %v941_v51  ;;  %v1717_v60 = vpack.c.bf16 %v948_v46, %v941_v51  ;;  %v847_v61 = vand.u32 4294901760, %v811_v52  ;;  %1694 = vmatpush3.bf16.msra.mxu1 %v2050_v53 }
 0x145   :  { %v950_v62 = vsub.f32 %v948_v46, %v949_v55  ;;  %v962_v63 = vsub.f32 %v812_v47, %v850_v56  ;;  %1695 = vmatprep.subr.bf16.mxu1 %v1839_v0  ;;  %v1738_v2 = vpack.c.bf16 %v935_v37, %v928_v41 }
 0x146   :  { %v943_v3 = vsub.f32 %v941_v51, %v942_v59  ;;  %v2054_v4 = vpack.c.bf16 %v850_v56, %v847_v61  ;;  %v955_v5 = vsub.f32 %v811_v52, %v847_v61  ;;  %v1702_v6 = vpack.c.bf16 %v937_v54, %v930_v58 }
 0x147   :  { %v951_v7 = vand.u32 4294901760, %v950_v62  ;;  %v963_v8 = vand.u32 4294901760, %v962_v63  ;;  %v1741_v11 = vpack.c.bf16 %v949_v55, %v942_v59 }
 0x148   :  { %v944_v12 = vand.u32 4294901760, %v943_v3  ;;  %v956_v13 = vand.u32 4294901760, %v955_v5  ;;  %v1720_v15 = vpack.c.bf16 %v962_v63, %v955_v5  ;;  %1697 = vmatpush3.bf16.msra.mxu1 %v2054_v4 }
 0x149   :  { %v964_v16 = vsub.f32 %v962_v63, %v963_v8  ;;  %1698 = vmatprep.subr.bf16.mxu1 %v1839_v0 }
 0x14a   :  { %v957_v19 = vsub.f32 %v955_v5, %v956_v13  ;;  %v1705_v21 = vpack.c.bf16 %v951_v7, %v944_v12  ;;  %v1744_v22 = vpack.c.bf16 %v963_v8, %v956_v13 }
 0x14b   :  { %v965_v23 = vand.u32 4294901760, %v964_v16  ;;  %1589 = vmatmul.mubr.f32.vlgmr.msra.gmra.mrb[0].mxu1 %v905_v10 }
 0x14c   :  { %v958_v25 = vand.u32 4294901760, %v957_v19  ;;  %1700 = vmatpush3.bf16.msra.mxu1 %v1699_v57  ;;  %1607 = vmatprep.mubr.msk.f32.mxu1 %vm1840_vm2, %v1841_v1 }
 0x14d   :  { %1701 = vmatprep.subr.bf16.mxu1 %v1839_v0 }
 0x14e   :  { %v1708_v26 = vpack.c.bf16 %v965_v23, %v958_v25 }
 0x150   :  { %1703 = vmatpush3.bf16.msra.mxu1 %v1702_v6 }
 0x151   :  { %1704 = vmatprep.subr.bf16.mxu1 %v1839_v0 }
 0x154   :  { %1706 = vmatpush3.bf16.msra.mxu1 %v1705_v21 }
 0x155   :  { %1707 = vmatprep.subr.bf16.mxu1 %v1839_v0 }
 0x158   :  { %1709 = vmatpush3.bf16.msra.mxu1 %v1708_v26 }
 0x159   :  { %1710 = vmatprep.subr.bf16.mxu1 %v1839_v0 }
 0x15b   :  { %1608 = vmatmul.mubr.f32.vlgmr.msra.gmra.mrb[0].mxu1 %v2011_v9 }
 0x15c   :  { %1712 = vmatpush3.bf16.msra.mxu1 %v1711_v24  ;;  %1626 = vmatprep.mubr.msk.f32.mxu1 %vm1840_vm2, %v1841_v1 }
 0x15d   :  { %1713 = vmatprep.subr.bf16.mxu1 %v1839_v0 }
 0x160   :  { %1715 = vmatpush3.bf16.msra.mxu1 %v1714_v42 }
 0x161   :  { %1716 = vmatprep.subr.bf16.mxu1 %v1839_v0 }
 0x164   :  { %1718 = vmatpush3.bf16.msra.mxu1 %v1717_v60 }
 0x165   :  { %1719 = vmatprep.subr.bf16.mxu1 %v1839_v0 }
 0x168   :  { %1721 = vmatpush3.bf16.msra.mxu1 %v1720_v15 }
 0x169   :  { %1722 = vmatprep.subr.bf16.mxu1 %v1839_v0 }
 0x16b   :  { %1627 = vmatmul.mubr.f32.vlgmr.msra.gmra.mrb[0].mxu1 %v2016_v17  ;;  %v821_v17 = vshrl.u32 %v820_v14, 7 }
 0x16c   :  { %1724 = vmatpush3.bf16.msra.mxu1 %v2020_v20  ;;  %1645 = vmatprep.mubr.msk.f32.mxu1 %vm1840_vm2, %v1841_v1 }
 0x16d   :  { %1725 = vmatprep.subr.bf16.mxu1 %v1839_v0  ;;  %v822_v18 = vsub.s32 0, %v821_v17 }
 0x170   :  { %1727 = vmatpush3.bf16.msra.mxu1 %v2035_v35 }
 0x171   :  { %1728 = vmatprep.subr.bf16.mxu1 %v1839_v0 }
 0x174   :  { %1730 = vmatpush3.bf16.msra.mxu1 %v2050_v53 }
 0x175   :  { %1731 = vmatprep.subr.bf16.mxu1 %v1839_v0 }
 0x178   :  { %1733 = vmatpush3.bf16.msra.mxu1 %v2054_v4 }
 0x179   :  { %1734 = vmatprep.subr.bf16.mxu1 %v1839_v0 }
 0x17b   :  { %1646 = vmatmul.mubr.f32.vlgmr.msra.gmra.mrb[0].mxu1 %v903_v31 }
 0x17c   :  { %1736 = vmatpush3.bf16.msra.mxu1 %v2038_v39  ;;  %1664 = vmatprep.mubr.msk.f32.mxu1 %vm1840_vm2, %v1841_v1 }
 0x17d   :  { %1737 = vmatprep.subr.bf16.mxu1 %v1839_v0 }
 0x180   :  { %1739 = vmatpush3.bf16.msra.mxu1 %v1738_v2 }
 0x181   :  { %1740 = vmatprep.subr.bf16.mxu1 %v1839_v0 }
 0x184   :  { %1742 = vmatpush3.bf16.msra.mxu1 %v1741_v11 }
 0x185   :  { %1743 = vmatprep.subr.bf16.mxu1 %v1839_v0 }
 0x188   :  { %1745 = vmatpush3.bf16.msra.mxu1 %v1744_v22 }
 0x189   :  { %1746 = vmatprep.subr.bf16.mxu1 %v1839_v0 }
 0x18b   :  { %1665 = vmatmul.mubr.f32.vlgmr.msra.gmra.mrb[0].mxu1 %v2011_v9 }
 0x18c   :  { %1748 = vmatpush3.bf16.msra.mxu1 %v2020_v20  ;;  %1683 = vmatprep.mubr.msk.f32.mxu1 %vm1840_vm2, %v1841_v1  ;;  %v818_v20 = vpop.permute.xlu0 %817 }
 0x18d   :  { %1749 = vmatprep.subr.bf16.mxu1 %v1839_v0  ;;  %v823_v24 = vrot.slane %v818_v20, %v822_v18 }
 0x190   :  { %1751 = vmatpush3.bf16.msra.mxu1 %v2035_v35 }
 0x191   :  { %1752 = vmatprep.subr.bf16.mxu1 %v1839_v0 }
 0x194   :  { %1754 = vmatpush3.bf16.msra.mxu1 %v2050_v53 }
 0x195   :  { %1755 = vmatprep.subr.bf16.mxu1 %v1839_v0 }
 0x198   :  { %1757 = vmatpush3.bf16.msra.mxu1 %v2054_v4 }
 0x19b   :  { %1684 = vmatmul.mubr.f32.vlgmr.msra.gmra.mrb[0].mxu1 %v2011_v9 }
 0x26e   :  { %v1361_v1 = vpop.f32.mrb[0].mxu1 }
 0x26f   :  { %v1758_v27 = vadd.f32 %v1361_v1, %v823_v24  ;;  %v1685_v28 = vpop.f32.mrb[1].mxu1 }
 0x271   :  { %1365 = vst [vmem:[#allocation3] sm:$0x1] %v1758_v27 }
 0x272   :  { %1826 = shalt.err (!%p1823_p4)
}
 0x273   :  { %s1827_s13 = scalar_lea.hbm %s2121_s4, 16 }
 0x274   :  { %p1828_p5 = scmp.ne.s32.totalorder %s2121_s4, %s1827_s13  ;;  %p1831_p6 = scmp.lt.u32.totalorder %s1827_s13, %s2121_s4 }
 0x276   :  { %p1833_p7 = pnand %p1831_p6, %p1828_p5 }
 0x278   :  { %1836 = shalt.err (!%p1833_p7)
}
 0x279   :  { %1375 = dma.vmem_to_hbm [thread:$0]  %s1373_s8, 16, %s2121_s4, [#allocation4]  }
 0x27a   :  { %1837 = dma.done.wait [#allocation4], 16  }
 0x27b   :  { %1838 = vsyncadd [#allocation4], 4294967280 }
 0x27c   :  { %1379 = vsyncpa [#allocation4], 1 }

</bundles_post_ra>
